<compile_context>
chip_gen: v6e
topology: v6e:2x2x1
jax: 0.10.0
libtpu: 0.0.40
codegen_flags: <defaults>
</compile_context>

<pallas_src>
import jax
import jax.numpy as jnp
from jax.experimental import pallas as pl
from jax.experimental.pallas import tpu as pltpu


def _learnable_sigmoid_kernel(params_ref, x_ref, o_ref):
    # params_ref lives in SMEM: [a, b] with a = 0.5*sc, b = 0.5*offset.
    a = params_ref[0]
    b = params_ref[1]
    z = x_ref[...].astype(jnp.float32) * a - b
    # sigmoid(x*sc - offset) == 0.5*tanh(0.5*(x*sc - offset)) + 0.5
    # -> a single EUP push per element + VALU filler; stays mem-bound.
    o_ref[...] = (0.5 * jnp.tanh(z) + 0.5).astype(o_ref.dtype)


def learnable_sigmoid(x, sc, offset, *, target_block_bytes=4 << 20):
    """sigmoid(x * sc - offset) elementwise via a Pallas TPU kernel.

    x: any-shaped float array (f32 or bf16; compute is f32, cast on store).
    sc, offset: scalars / 0-d arrays (the learnable scalars).
    """
    orig_shape = x.shape
    orig_dtype = x.dtype
    total = x.size
    itemsize = jnp.dtype(orig_dtype).itemsize

    sc_f = jnp.asarray(sc, jnp.float32)
    off_f = jnp.asarray(offset, jnp.float32)
    a = 0.5 * sc_f          # pre-folded scalar math (wrapper side, not per-element)
    b = 0.5 * off_f

    # Tiny inputs: not worth a kernel launch / lane padding.
    if total < 128:
        y = jax.nn.sigmoid(x.astype(jnp.float32) * sc_f - off_f)
        return y.astype(orig_dtype)

    xflat = x.reshape(-1)
    rem = total % 128                 # <128-element tail handled in plain JAX
    main_n = total - rem
    xmain = xflat[:main_n]

    # Widest lane-dense width that divides the 128-aligned prefix.
    lanes = 128
    for w in (1024, 512, 256):
        if main_n % w == 0:
            lanes = w
            break
    rows = main_n // lanes
    x2d = xmain.reshape(rows, lanes)

    # Dtype-aware sublane granule: 8 rows (f32), 16 (bf16), 32 (int8/fp8).
    granule = max(8, 32 // itemsize)

    # ~4 MiB input blocks (review: 2-4 MiB generic, 4-8 MiB fine on v7x);
    # safe everywhere because we raise vmem_limit_bytes explicitly below.
    max_rows = max(granule, target_block_bytes // (lanes * itemsize))
    if rows <= max_rows:
        block_rows = rows             # single block == full array dims
    else:
        block_rows = int(max_rows) - int(max_rows) % granule
        block_rows = max(block_rows, granule)

    grid = (pl.cdiv(rows, block_rows),)  # partial last block masked by Pallas

    # Scoped VMEM: in + out, double-buffered, plus headroom for compiler scratch.
    block_bytes = block_rows * lanes * itemsize
    vmem_limit = int(min(48 << 20, max(16 << 20, 4 * block_bytes + (8 << 20))))

    params = jnp.stack([a, b]).astype(jnp.float32)

    out2d = pl.pallas_call(
        _learnable_sigmoid_kernel,
        out_shape=jax.ShapeDtypeStruct((rows, lanes), orig_dtype),
        grid=grid,
        in_specs=[
            pl.BlockSpec(memory_space=pltpu.MemorySpace.SMEM),   # [a, b] scalars
            pl.BlockSpec((block_rows, lanes), lambda i: (i, 0)),
        ],
        out_specs=pl.BlockSpec((block_rows, lanes), lambda i: (i, 0)),
        compiler_params=pltpu.CompilerParams(
            # TODO(synk): on v7x verify in xprof that the 1-D parallel grid is
            # sharded across both TensorCores; if not, switch to CORE_PARALLEL.
            dimension_semantics=("parallel",),
            vmem_limit_bytes=vmem_limit,
        ),
    )(params, x2d)

    out = out2d.reshape(-1)
    if rem:
        xtail = xflat[main_n:].astype(jnp.float32)
        tail = jax.nn.sigmoid(xtail * sc_f - off_f).astype(orig_dtype)
        out = jnp.concatenate([out, tail])
    return out.reshape(orig_shape)


if __name__ == "__main__":
    # Deterministic parameter init mirroring the module's __init__:
    #   scale = 5, init_value = 0.5  ->  sc = 5.0, offset = 2.5
    scale = 5.0
    init_value = 0.5
    sc = jnp.float32(scale)
    offset = jnp.float32(scale * init_value)
    # TODO(synk): the module also constructs pyg_nn.MLP([1, 4, 1]) but never
    # uses it in forward(), so it is intentionally omitted here.

    key = jax.random.PRNGKey(0)
    x = jax.random.normal(key, (2, 4, 16, 16), dtype=jnp.float32)

    out = learnable_sigmoid(x, sc, offset)
    out = jax.block_until_ready(out)

    # Reference check in plain JAX.
    ref = jax.nn.sigmoid(x * sc - offset)
    assert out.shape == x.shape
    assert jnp.allclose(out, ref, atol=1e-5), "mismatch vs reference"

    print("KERNEL_OK")
</pallas_src>

<mosaic_0001>
module attributes {stable_mosaic.version = 11 : i64} {
  func.func @_learnable_sigmoid_kernel(%arg0: i32, %arg1: memref<2xf32, #tpu.memory_space<smem>>, %arg2: memref<2x1024xf32, #tpu.memory_space<vmem>>, %arg3: memref<2x1024xf32, #tpu.memory_space<vmem>>) attributes {dimension_semantics = [#tpu.dimension_semantics<parallel>], iteration_bounds = array<i64: 1>, scalar_prefetch = 0 : i64, scratch_operands = 0 : i64, tpu.core_type = #tpu.core_type<tc>, window_params = [{transform_indices = @transform_0, window_bounds = array<i64: 2>}, {transform_indices = @transform_1, window_bounds = array<i64: 2, 1024>}, {transform_indices = @transform_2, window_bounds = array<i64: 2, 1024>}]} {
    %c0 = arith.constant 0 : index
    %0 = memref.load %arg1[%c0] : memref<2xf32, #tpu.memory_space<smem>>
    %c1 = arith.constant 1 : index
    %1 = memref.load %arg1[%c1] : memref<2xf32, #tpu.memory_space<smem>>
    %c0_0 = arith.constant 0 : index
    %c0_1 = arith.constant 0 : index
    %2 = vector.load %arg2[%c0_0, %c0_1] : memref<2x1024xf32, #tpu.memory_space<vmem>>, vector<2x1024xf32>
    %3 = vector.broadcast %0 : f32 to vector<2x1024xf32>
    %4 = arith.mulf %2, %3 : vector<2x1024xf32>
    %5 = vector.broadcast %1 : f32 to vector<2x1024xf32>
    %6 = arith.subf %4, %5 : vector<2x1024xf32>
    %7 = math.tanh %6 : vector<2x1024xf32>
    %cst = arith.constant 5.000000e-01 : f32
    %8 = vector.broadcast %cst : f32 to vector<2x1024xf32>
    %9 = arith.mulf %8, %7 : vector<2x1024xf32>
    %cst_2 = arith.constant 5.000000e-01 : f32
    %10 = vector.broadcast %cst_2 : f32 to vector<2x1024xf32>
    %11 = arith.addf %9, %10 : vector<2x1024xf32>
    %c0_3 = arith.constant 0 : index
    %c0_4 = arith.constant 0 : index
    %12 = vector.load %arg3[%c0_3, %c0_4] : memref<2x1024xf32, #tpu.memory_space<vmem>>, vector<2x1024xf32>
    tpu.vector_store %arg3[%c0_3, %c0_4], %11 {strides = array<i32>} : memref<2x1024xf32, #tpu.memory_space<vmem>>, vector<2x1024xf32>,
    return
  }
  func.func @transform_0(%arg0: i32) -> i32 {
    %c0_i32 = arith.constant 0 : i32
    %c0_i32_0 = arith.constant 0 : i32
    return %c0_i32 : i32
  }
  func.func @transform_1(%arg0: i32) -> (i32, i32) {
    %c0_i32 = arith.constant 0 : i32
    %c0_i32_0 = arith.constant 0 : i32
    return %arg0, %c0_i32 : i32, i32
  }
  func.func @transform_2(%arg0: i32) -> (i32, i32) {
    %c0_i32 = arith.constant 0 : i32
    %c0_i32_0 = arith.constant 0 : i32
    return %arg0, %c0_i32 : i32, i32
  }
}

</mosaic_0001>

<bundles_post_ra>
// kernel: tpu_custom_call.1
= control target key start
LH: loop header
LB: loop body
LE: loop exit
PB: predicated region body
PF: predicated region fallthrough
CT: control target
= control target key end

     0   :  { %7 = vsyncpa [#allocation5], 0  ;;  %s158_s0 = inlined_call_operand.hbm [shape: f32[2], index: 0, kind: input, shape index: {}]   ;;  %s159_s1 = inlined_call_operand.hbm [shape: f32[2,1024], index: 1, kind: input, shape index: {}]   ;;  %s160_s2 = inlined_call_operand.hbm [shape: f32[2,1024], index: 2, kind: output, shape index: {}]  }
   0x1   :  { %8 = vsyncpa [#allocation3], 0 }
   0x2   :  { %9 = vsyncpa [#allocation4], 0  ;;  %s131_s9 = smov [#allocation2]   ;;  %s132_s12 = smov [#allocation6]  }
   0x3   :  { %17 = dma.hbm_to_smem %s158_s0, 16, %s131_s9, [#allocation5]  }
   0x4   :  { %s24_s13 = sshll.u32 %s132_s12, 4  ;;  %s25_s13 = int_to_ptr.vmem [resolvable:$true] %s24_s13 }
   0x5   :  { %s93_s14 = scalar_lea.vmem %s25_s13, 256  ;;  %p98_p1 = scmp.lt.s32.totalorder %s25_s13, %s25_s13 }
   0x6   :  { %p94_p0 = scmp.ne.s32.totalorder %s25_s13, %s93_s14  ;;  %p99_p2 = scmp.lt.s32.totalorder %s93_s14, %s93_s14 }
   0x8   :  { %p100_p3 = por %p99_p2, %p98_p1 }
   0xa   :  { %p101_p4 = pnand %p100_p3, %p94_p0 }
   0xc   :  { %104 = shalt.err (!%p101_p4)
}
   0xd   :  { %27 = dma.hbm_to_vmem [thread:$0]  %s159_s1, 256, %s25_s13, [#allocation3]  }
   0xe   :  { %125 = dma.done.wait [#allocation5], 16  }
   0xf   :  { %126 = vsyncadd [#allocation5], 4294967280 }
  0x10   :  { %127 = dma.done.wait [#allocation3], 256  }
  0x11   :  { %128 = vsyncadd [#allocation3], 4294967040 }
  0x12   :  { %34 = sfence }
  0x13   :  { %s35_s0 = sld [smem:[#allocation2]]  ;;  %v37_v0 = vld [vmem:[#allocation6] sm:$0xff]  ;;  %v38_v1 = vld [vmem:[#allocation6 + $0x8] sm:$0xff]  ;;  %s133_s1 = smov [#allocation7]  }
  0x14   :  { %s69_s17 = sld [smem:[#allocation2 + $0x1]]  ;;  %s59_s18 = sshll.u32 %s133_s1, 4  ;;  %s60_s18 = int_to_ptr.vmem [resolvable:$true] %s59_s18 }
  0x15   :  { %s105_s19 = scalar_lea.vmem %s60_s18, 256  ;;  %p110_p6 = scmp.lt.s32.totalorder %s60_s18, %s60_s18 }
  0x16   :  { %p106_p5 = scmp.ne.s32.totalorder %s60_s18, %s105_s19  ;;  %p111_p7 = scmp.lt.s32.totalorder %s105_s19, %s105_s19 }
  0x18   :  { %p112_p8 = por %p111_p7, %p110_p6 }
  0x19   :  { %v39_v2 = vstv %s35_s0 }
  0x1a   :  { %v40_v3 = vmul.f32 %v39_v2, %v37_v0  ;;  %v42_v4 = vstv %s69_s17  ;;  %v41_v5 = vmul.f32 %v39_v2, %v38_v1  ;;  %p113_p9 = pnand %p112_p8, %p106_p5 }
  0x1c   :  { %v43_v6 = vsub.f32 %v40_v3, %v42_v4  ;;  %v44_v7 = vsub.f32 %v41_v5, %v42_v4 }
  0x1e   :  { %73 = vtanh.f32 %v43_v6 }
  0x1f   :  { %75 = vtanh.f32 %v44_v7 }
  0x2b   :  { %v74_v8 = vpop.eup %73 }
  0x2c   :  { %v76_v9 = vpop.eup %75  ;;  %v47_v10 = vmul.f32 0.5, %v74_v8 }
  0x2d   :  { %v48_v11 = vmul.f32 0.5, %v76_v9 }
  0x2e   :  { %v49_v12 = vadd.f32 0.5, %v47_v10 }
  0x2f   :  { %v50_v13 = vadd.f32 0.5, %v48_v11 }
  0x30   :  { %51 = vst [vmem:[#allocation7] sm:$0xff] %v49_v12 }
  0x31   :  { %52 = vst [vmem:[#allocation7 + $0x8] sm:$0xff] %v50_v13 }
  0x32   :  { %116 = shalt.err (!%p113_p9)
}
  0x33   :  { %62 = dma.vmem_to_hbm [thread:$0]  %s60_s18, 256, %s160_s2, [#allocation4]  }
  0x34   :  { %129 = dma.done.wait [#allocation4], 256  }
  0x35   :  { %130 = vsyncadd [#allocation4], 4294967040 }
  0x36   :  { %66 = vsyncpa [#allocation3], 1 }
  0x37   :  { %67 = vsyncpa [#allocation4], 1 }
  0x38   :  { %68 = vsyncpa [#allocation5], 1 }

</bundles_post_ra>
